<compile_context>
chip_gen: v6e
topology: v6e:2x2x1
jax: 0.10.0
libtpu: 0.0.40
codegen_flags: <defaults>
</compile_context>

<pallas_src>
import jax
import jax.numpy as jnp
from jax.experimental import pallas as pl
from jax.experimental.pallas import tpu as pltpu

HIDDEN = 128


def policy_kernel(x_ref, inp_mean_ref, inv_inp_std_ref,
                  w1_ref, b1_ref, w2_ref, b2_ref, w3_ref, b3_ref,
                  out_mean_ref, out_std_ref, o_ref):
    # Normalize input in f32 (multiply by precomputed reciprocal, no divide).
    h = (x_ref[...] - inp_mean_ref[...]) * inv_inp_std_ref[...]
    # fc1: Linear + ReLU (dropout = identity at inference).
    # bf16 operands, f32 accumulation on the MXU.
    h = jnp.dot(h.astype(jnp.bfloat16), w1_ref[...],
                preferred_element_type=jnp.float32) + b1_ref[...]
    h = jnp.maximum(h, 0.0)
    # fc2: Linear + ReLU
    h = jnp.dot(h.astype(jnp.bfloat16), w2_ref[...],
                preferred_element_type=jnp.float32) + b2_ref[...]
    h = jnp.maximum(h, 0.0)
    # final Linear
    h = jnp.dot(h.astype(jnp.bfloat16), w3_ref[...],
                preferred_element_type=jnp.float32) + b3_ref[...]
    # De-normalize output in f32.
    o_ref[...] = out_mean_ref[...] + out_std_ref[...] * h


def _choose_bm(B):
    """Pick a batch tile: multiple of 8, as large as comfortable.

    - Small batches: one block covering the whole batch (rounded up to 8).
    - Large batches: 512-row tiles (multiple of 256 for v6e's 2x256 MXU),
      which guarantees grid length >= 2 so v7x megacore sharding has work
      on both TensorCores, while keeping the double-buffered x tile tiny
      relative to VMEM (even on v7x's 64 MiB).
    """
    b8 = ((B + 7) // 8) * 8
    return b8 if b8 <= 512 else 512


def policy_forward(x, params, *, bm=None):
    """x: (B, inp_dim) float32. params: dict of f32 weights/buffers."""
    B, inp_dim = x.shape
    out_dim = params["b3"].shape[-1]
    if bm is None:
        bm = _choose_bm(B)
    grid = (pl.cdiv(B, bm),)

    # Precompute reciprocal of inp_std once (outside the kernel hot path).
    inv_inp_std = 1.0 / params["inp_std"]
    # Pre-cast weights to bf16 for MXU peak throughput (f32 accumulation in-kernel).
    w1 = params["w1"].astype(jnp.bfloat16)
    w2 = params["w2"].astype(jnp.bfloat16)
    w3 = params["w3"].astype(jnp.bfloat16)

    # Full-array (non-batch-tiled) operands: params & buffers.
    def rep(shape):
        return pl.BlockSpec(shape, lambda i, _n=len(shape): (0,) * _n)

    return pl.pallas_call(
        policy_kernel,
        out_shape=jax.ShapeDtypeStruct((B, out_dim), jnp.float32),
        grid_spec=pltpu.PrefetchScalarGridSpec(
            num_scalar_prefetch=0,
            grid=grid,
            in_specs=[
                pl.BlockSpec((bm, inp_dim), lambda i: (i, 0)),      # x (batch-tiled)
                rep((1, inp_dim)),                                   # inp_mean
                rep((1, inp_dim)),                                   # 1 / inp_std
                rep((inp_dim, HIDDEN)),                              # W1 (in, out) bf16
                rep((1, HIDDEN)),                                    # b1
                rep((HIDDEN, HIDDEN)),                               # W2 bf16
                rep((1, HIDDEN)),                                    # b2
                rep((HIDDEN, out_dim)),                              # W3 bf16
                rep((1, out_dim)),                                   # b3
                rep((1, out_dim)),                                   # out_mean
                rep((1, out_dim)),                                   # out_std
            ],
            out_specs=pl.BlockSpec((bm, out_dim), lambda i: (i, 0)),
        ),
        compiler_params=pltpu.CompilerParams(
            dimension_semantics=("parallel",)),
    )(x,
      params["inp_mean"], inv_inp_std,
      w1, params["b1"],
      w2, params["b2"],
      w3, params["b3"],
      params["out_mean"], params["out_std"])


def init_params(key, inp_dim, out_dim):
    """Deterministic synthetic parameters matching Policy.__init__ shapes."""
    k1, k2, k3, k4, k5, k6 = jax.random.split(key, 6)

    def linear(kw, kb, fan_in, fan_out):
        # Kaiming-uniform-ish like torch's default Linear init
        bound = 1.0 / jnp.sqrt(fan_in)
        w = jax.random.uniform(kw, (fan_in, fan_out), jnp.float32, -bound, bound)
        b = jax.random.uniform(kb, (1, fan_out), jnp.float32, -bound, bound)
        return w, b

    w1, b1 = linear(k1, k2, inp_dim, HIDDEN)
    w2, b2 = linear(k3, k4, HIDDEN, HIDDEN)
    w3, b3 = linear(k5, k6, HIDDEN, out_dim)
    return {
        "w1": w1, "b1": b1,
        "w2": w2, "b2": b2,
        "w3": w3, "b3": b3,
        # registered buffers: zeros / ones, reshaped to (1, D) for broadcasting
        "inp_mean": jnp.zeros((1, inp_dim), jnp.float32),
        "inp_std": jnp.ones((1, inp_dim), jnp.float32),
        "out_mean": jnp.zeros((1, out_dim), jnp.float32),
        "out_std": jnp.ones((1, out_dim), jnp.float32),
    }


def policy_reference(x, p):
    h = (x - p["inp_mean"]) / p["inp_std"]
    h = jnp.maximum(h @ p["w1"] + p["b1"], 0.0)
    h = jnp.maximum(h @ p["w2"] + p["b2"], 0.0)
    h = h @ p["w3"] + p["b3"]
    return p["out_mean"] + p["out_std"] * h


if __name__ == "__main__":
    key = jax.random.PRNGKey(0)
    kx, kp = jax.random.split(key)

    B, INP_DIM, OUT_DIM = 64, 32, 8
    x = jax.random.normal(kx, (B, INP_DIM), jnp.float32)
    params = init_params(kp, INP_DIM, OUT_DIM)

    out = policy_forward(x, params)
    jax.block_until_ready(out)

    ref = policy_reference(x, params)
    assert out.shape == (B, OUT_DIM)
    # Tolerance loosened vs the pure-f32 version because the kernel runs the
    # matmuls in bf16 (with f32 accumulation).
    assert jnp.allclose(out, ref, atol=5e-2, rtol=5e-2), (
        f"max abs err = {float(jnp.max(jnp.abs(out - ref)))}")

    print("KERNEL_OK")
</pallas_src>

<mosaic_0001>
module attributes {stable_mosaic.version = 11 : i64} {
  func.func @policy_kernel(%arg0: i32, %arg1: memref<64x32xf32, #tpu.memory_space<vmem>>, %arg2: memref<1x32xf32, #tpu.memory_space<vmem>>, %arg3: memref<1x32xf32, #tpu.memory_space<vmem>>, %arg4: memref<32x128xbf16, #tpu.memory_space<vmem>>, %arg5: memref<1x128xf32, #tpu.memory_space<vmem>>, %arg6: memref<128x128xbf16, #tpu.memory_space<vmem>>, %arg7: memref<1x128xf32, #tpu.memory_space<vmem>>, %arg8: memref<128x8xbf16, #tpu.memory_space<vmem>>, %arg9: memref<1x8xf32, #tpu.memory_space<vmem>>, %arg10: memref<1x8xf32, #tpu.memory_space<vmem>>, %arg11: memref<1x8xf32, #tpu.memory_space<vmem>>, %arg12: memref<64x8xf32, #tpu.memory_space<vmem>>) attributes {dimension_semantics = [#tpu.dimension_semantics<parallel>], iteration_bounds = array<i64: 1>, scalar_prefetch = 0 : i64, scratch_operands = 0 : i64, tpu.core_type = #tpu.core_type<tc>, window_params = [{transform_indices = @transform_0, window_bounds = array<i64: 64, 32>}, {pipeline_mode = #tpu.pipeline_mode<synchronous>, transform_indices = @transform_1, window_bounds = array<i64: 1, 32>}, {pipeline_mode = #tpu.pipeline_mode<synchronous>, transform_indices = @transform_2, window_bounds = array<i64: 1, 32>}, {pipeline_mode = #tpu.pipeline_mode<synchronous>, transform_indices = @transform_3, window_bounds = array<i64: 32, 128>}, {pipeline_mode = #tpu.pipeline_mode<synchronous>, transform_indices = @transform_4, window_bounds = array<i64: 1, 128>}, {pipeline_mode = #tpu.pipeline_mode<synchronous>, transform_indices = @transform_5, window_bounds = array<i64: 128, 128>}, {pipeline_mode = #tpu.pipeline_mode<synchronous>, transform_indices = @transform_6, window_bounds = array<i64: 1, 128>}, {pipeline_mode = #tpu.pipeline_mode<synchronous>, transform_indices = @transform_7, window_bounds = array<i64: 128, 8>}, {pipeline_mode = #tpu.pipeline_mode<synchronous>, transform_indices = @transform_8, window_bounds = array<i64: 1, 8>}, {pipeline_mode = #tpu.pipeline_mode<synchronous>, transform_indices = @transform_9, window_bounds = array<i64: 1, 8>}, {pipeline_mode = #tpu.pipeline_mode<synchronous>, transform_indices = @transform_10, window_bounds = array<i64: 1, 8>}, {transform_indices = @transform_11, window_bounds = array<i64: 64, 8>}]} {
    %c0 = arith.constant 0 : index
    %c0_0 = arith.constant 0 : index
    %0 = vector.load %arg1[%c0, %c0_0] : memref<64x32xf32, #tpu.memory_space<vmem>>, vector<64x32xf32>
    %c0_1 = arith.constant 0 : index
    %c0_2 = arith.constant 0 : index
    %1 = vector.load %arg2[%c0_1, %c0_2] : memref<1x32xf32, #tpu.memory_space<vmem>>, vector<1x32xf32>
    %2 = vector.broadcast %1 : vector<1x32xf32> to vector<64x32xf32>
    %3 = arith.subf %0, %2 : vector<64x32xf32>
    %c0_3 = arith.constant 0 : index
    %c0_4 = arith.constant 0 : index
    %4 = vector.load %arg3[%c0_3, %c0_4] : memref<1x32xf32, #tpu.memory_space<vmem>>, vector<1x32xf32>
    %5 = vector.broadcast %4 : vector<1x32xf32> to vector<64x32xf32>
    %6 = arith.mulf %3, %5 : vector<64x32xf32>
    %7 = arith.truncf %6 : vector<64x32xf32> to vector<64x32xbf16>
    %c0_5 = arith.constant 0 : index
    %c0_6 = arith.constant 0 : index
    %8 = vector.load %arg4[%c0_5, %c0_6] : memref<32x128xbf16, #tpu.memory_space<vmem>>, vector<32x128xbf16>
    %cst = arith.constant dense<0.000000e+00> : vector<64x128xf32>
    %9 = tpu.matmul %7, %8, %cst {dimension_numbers = #tpu.dot_dimension_numbers<[1], [0], [0], [1], [0, 0, 1, 1], [], []>} : vector<64x32xbf16>, vector<32x128xbf16>, vector<64x128xf32> -> vector<64x128xf32>
    %c0_7 = arith.constant 0 : index
    %c0_8 = arith.constant 0 : index
    %10 = vector.load %arg5[%c0_7, %c0_8] : memref<1x128xf32, #tpu.memory_space<vmem>>, vector<1x128xf32>
    %11 = vector.broadcast %10 : vector<1x128xf32> to vector<64x128xf32>
    %12 = arith.addf %9, %11 : vector<64x128xf32>
    %cst_9 = arith.constant 0.000000e+00 : f32
    %13 = vector.broadcast %cst_9 : f32 to vector<64x128xf32>
    %14 = arith.maximumf %12, %13 : vector<64x128xf32>
    %15 = arith.truncf %14 : vector<64x128xf32> to vector<64x128xbf16>
    %c0_10 = arith.constant 0 : index
    %c0_11 = arith.constant 0 : index
    %16 = vector.load %arg6[%c0_10, %c0_11] : memref<128x128xbf16, #tpu.memory_space<vmem>>, vector<128x128xbf16>
    %cst_12 = arith.constant dense<0.000000e+00> : vector<64x128xf32>
    %17 = tpu.matmul %15, %16, %cst_12 {dimension_numbers = #tpu.dot_dimension_numbers<[1], [0], [0], [1], [0, 0, 1, 1], [], []>} : vector<64x128xbf16>, vector<128x128xbf16>, vector<64x128xf32> -> vector<64x128xf32>
    %c0_13 = arith.constant 0 : index
    %c0_14 = arith.constant 0 : index
    %18 = vector.load %arg7[%c0_13, %c0_14] : memref<1x128xf32, #tpu.memory_space<vmem>>, vector<1x128xf32>
    %19 = vector.broadcast %18 : vector<1x128xf32> to vector<64x128xf32>
    %20 = arith.addf %17, %19 : vector<64x128xf32>
    %cst_15 = arith.constant 0.000000e+00 : f32
    %21 = vector.broadcast %cst_15 : f32 to vector<64x128xf32>
    %22 = arith.maximumf %20, %21 : vector<64x128xf32>
    %23 = arith.truncf %22 : vector<64x128xf32> to vector<64x128xbf16>
    %c0_16 = arith.constant 0 : index
    %c0_17 = arith.constant 0 : index
    %24 = vector.load %arg8[%c0_16, %c0_17] : memref<128x8xbf16, #tpu.memory_space<vmem>>, vector<128x8xbf16>
    %cst_18 = arith.constant dense<0.000000e+00> : vector<64x8xf32>
    %25 = tpu.matmul %23, %24, %cst_18 {dimension_numbers = #tpu.dot_dimension_numbers<[1], [0], [0], [1], [0, 0, 1, 1], [], []>} : vector<64x128xbf16>, vector<128x8xbf16>, vector<64x8xf32> -> vector<64x8xf32>
    %c0_19 = arith.constant 0 : index
    %c0_20 = arith.constant 0 : index
    %26 = vector.load %arg9[%c0_19, %c0_20] : memref<1x8xf32, #tpu.memory_space<vmem>>, vector<1x8xf32>
    %27 = vector.broadcast %26 : vector<1x8xf32> to vector<64x8xf32>
    %28 = arith.addf %25, %27 : vector<64x8xf32>
    %c0_21 = arith.constant 0 : index
    %c0_22 = arith.constant 0 : index
    %29 = vector.load %arg10[%c0_21, %c0_22] : memref<1x8xf32, #tpu.memory_space<vmem>>, vector<1x8xf32>
    %c0_23 = arith.constant 0 : index
    %c0_24 = arith.constant 0 : index
    %30 = vector.load %arg11[%c0_23, %c0_24] : memref<1x8xf32, #tpu.memory_space<vmem>>, vector<1x8xf32>
    %31 = vector.broadcast %30 : vector<1x8xf32> to vector<64x8xf32>
    %32 = arith.mulf %31, %28 : vector<64x8xf32>
    %33 = vector.broadcast %29 : vector<1x8xf32> to vector<64x8xf32>
    %34 = arith.addf %33, %32 : vector<64x8xf32>
    %c0_25 = arith.constant 0 : index
    %c0_26 = arith.constant 0 : index
    %35 = vector.load %arg12[%c0_25, %c0_26] : memref<64x8xf32, #tpu.memory_space<vmem>>, vector<64x8xf32>
    tpu.vector_store %arg12[%c0_25, %c0_26], %34 {strides = array<i32>} : memref<64x8xf32, #tpu.memory_space<vmem>>, vector<64x8xf32>,
    return
  }
  func.func @transform_0(%arg0: i32) -> (i32, i32) {
    %c0_i32 = arith.constant 0 : i32
    %c0_i32_0 = arith.constant 0 : i32
    return %arg0, %c0_i32 : i32, i32
  }
  func.func @transform_1(%arg0: i32) -> (i32, i32) {
    %c0_i32 = arith.constant 0 : i32
    %c0_i32_0 = arith.constant 0 : i32
    %c0_i32_1 = arith.constant 0 : i32
    return %c0_i32, %c0_i32_0 : i32, i32
  }
  func.func @transform_2(%arg0: i32) -> (i32, i32) {
    %c0_i32 = arith.constant 0 : i32
    %c0_i32_0 = arith.constant 0 : i32
    %c0_i32_1 = arith.constant 0 : i32
    return %c0_i32, %c0_i32_0 : i32, i32
  }
  func.func @transform_3(%arg0: i32) -> (i32, i32) {
    %c0_i32 = arith.constant 0 : i32
    %c0_i32_0 = arith.constant 0 : i32
    %c0_i32_1 = arith.constant 0 : i32
    return %c0_i32, %c0_i32_0 : i32, i32
  }
  func.func @transform_4(%arg0: i32) -> (i32, i32) {
    %c0_i32 = arith.constant 0 : i32
    %c0_i32_0 = arith.constant 0 : i32
    %c0_i32_1 = arith.constant 0 : i32
    return %c0_i32, %c0_i32_0 : i32, i32
  }
  func.func @transform_5(%arg0: i32) -> (i32, i32) {
    %c0_i32 = arith.constant 0 : i32
    %c0_i32_0 = arith.constant 0 : i32
    %c0_i32_1 = arith.constant 0 : i32
    return %c0_i32, %c0_i32_0 : i32, i32
  }
  func.func @transform_6(%arg0: i32) -> (i32, i32) {
    %c0_i32 = arith.constant 0 : i32
    %c0_i32_0 = arith.constant 0 : i32
    %c0_i32_1 = arith.constant 0 : i32
    return %c0_i32, %c0_i32_0 : i32, i32
  }
  func.func @transform_7(%arg0: i32) -> (i32, i32) {
    %c0_i32 = arith.constant 0 : i32
    %c0_i32_0 = arith.constant 0 : i32
    %c0_i32_1 = arith.constant 0 : i32
    return %c0_i32, %c0_i32_0 : i32, i32
  }
  func.func @transform_8(%arg0: i32) -> (i32, i32) {
    %c0_i32 = arith.constant 0 : i32
    %c0_i32_0 = arith.constant 0 : i32
    %c0_i32_1 = arith.constant 0 : i32
    return %c0_i32, %c0_i32_0 : i32, i32
  }
  func.func @transform_9(%arg0: i32) -> (i32, i32) {
    %c0_i32 = arith.constant 0 : i32
    %c0_i32_0 = arith.constant 0 : i32
    %c0_i32_1 = arith.constant 0 : i32
    return %c0_i32, %c0_i32_0 : i32, i32
  }
  func.func @transform_10(%arg0: i32) -> (i32, i32) {
    %c0_i32 = arith.constant 0 : i32
    %c0_i32_0 = arith.constant 0 : i32
    %c0_i32_1 = arith.constant 0 : i32
    return %c0_i32, %c0_i32_0 : i32, i32
  }
  func.func @transform_11(%arg0: i32) -> (i32, i32) {
    %c0_i32 = arith.constant 0 : i32
    %c0_i32_0 = arith.constant 0 : i32
    return %arg0, %c0_i32 : i32, i32
  }
}

</mosaic_0001>

<bundles_post_ra>
// kernel: tpu_custom_call.1
= control target key start
LH: loop header
LB: loop body
LE: loop exit
PB: predicated region body
PF: predicated region fallthrough
CT: control target
= control target key end

     0   :  { %vm104_vm0 = vcmask 261120   ;;  %vm508_vm1 = vcmask 64512   ;;  %s853_s3 = inlined_call_operand.vmem [shape: bf16[32,128], index: 3, kind: input, shape index: {}]   ;;  %s854_s0 = inlined_call_operand.vmem [shape: f32[64,32], index: 0, kind: input, shape index: {}]   ;;  %s855_s1 = inlined_call_operand.vmem [shape: f32[1,32], index: 1, kind: input, shape index: {}]   ;;  %s856_s2 = inlined_call_operand.vmem [shape: f32[1,32], index: 2, kind: input, shape index: {}]   ;;  %s857_s5 = inlined_call_operand.vmem [shape: bf16[128,128], index: 5, kind: input, shape index: {}]   ;;  %s858_s7 = inlined_call_operand.vmem [shape: bf16[128,8], index: 7, kind: input, shape index: {}]   ;;  %s859_s4 = inlined_call_operand.vmem [shape: f32[1,128], index: 4, kind: input, shape index: {}]   ;;  %s860_s6 = inlined_call_operand.vmem [shape: f32[1,128], index: 6, kind: input, shape index: {}]   ;;  %s861_s8 = inlined_call_operand.vmem [shape: f32[1,8], index: 8, kind: input, shape index: {}]   ;;  %s862_s10 = inlined_call_operand.vmem [shape: f32[1,8], index: 10, kind: input, shape index: {}]   ;;  %s863_s9 = inlined_call_operand.vmem [shape: f32[1,8], index: 9, kind: input, shape index: {}]   ;;  %s864_s11 = inlined_call_operand.vmem [shape: f32[64,8], index: 11, kind: output, shape index: {}]  }
   0x1   :  { %v640_v0 = vld [vmem:[%s853_s3 + $0x8] sm:$0xff]   ;;  %v641_v1 = vld [vmem:[%s853_s3] sm:$0xff]   ;;  %v41_v8 = vld [vmem:[%s854_s0 + $0x10] sm:$0xff] }
   0x2   :  { %580 = vmatprep.subr.bf16.mxu0 %v640_v0  ;;  %v39_v2 = vld [vmem:[%s854_s0] sm:$0xff]  ;;  %v40_v3 = vld [vmem:[%s854_s0 + $0x8] sm:$0xff]  ;;  %v42_v9 = vld [vmem:[%s854_s0 + $0x18] sm:$0xff] }
   0x3   :  { %v521_v4 = vld [vmem:[%s855_s1] ss:$0 sm:$0xff]  ;;  %581 = vmatpush3.bf16.msra.mxu0 %v640_v0  ;;  %v44_v13 = vld [vmem:[%s854_s0 + $0x28] sm:$0xff]  ;;  %v45_v14 = vld [vmem:[%s854_s0 + $0x30] sm:$0xff] }
   0x4   :  { %v54_v5 = vsub.f32 %v39_v2, %v521_v4  ;;  %v55_v6 = vsub.f32 %v40_v3, %v521_v4  ;;  %v522_v7 = vld [vmem:[%s856_s2] ss:$0 sm:$0xff]  ;;  %582 = vmatprep.subr.bf16.mxu0 %v641_v1  ;;  %v56_v10 = vsub.f32 %v41_v8, %v521_v4  ;;  %v57_v11 = vsub.f32 %v42_v9, %v521_v4  ;;  %v46_v19 = vld [vmem:[%s854_s0 + $0x38] sm:$0xff]  ;;  %v643_v28 = vld [vmem:[%s857_s5 + $0x30] sm:$0xff]  }
   0x5   :  { %v43_v12 = vld [vmem:[%s854_s0 + $0x20] sm:$0xff]  ;;  %v59_v18 = vsub.f32 %v44_v13, %v521_v4  ;;  %v60_v22 = vsub.f32 %v45_v14, %v521_v4  ;;  %v61_v23 = vsub.f32 %v46_v19, %v521_v4  ;;  %v642_v24 = vld [vmem:[%s857_s5 + $0x38] sm:$0xff]   ;;  %v644_v33 = vld [vmem:[%s857_s5 + $0x28] sm:$0xff]  }
   0x6   :  { %v69_v15 = vmul.f32 %v522_v7, %v54_v5  ;;  %v70_v16 = vmul.f32 %v522_v7, %v55_v6  ;;  %v58_v17 = vsub.f32 %v43_v12, %v521_v4  ;;  %v71_v20 = vmul.f32 %v522_v7, %v56_v10  ;;  %592 = vmatprep.subr.bf16.mxu1 %v642_v24  ;;  %v645_v35 = vld [vmem:[%s857_s5 + $0x20] sm:$0xff]   ;;  %v646_v36 = vld [vmem:[%s857_s5 + $0x18] sm:$0xff]   ;;  %v647_v37 = vld [vmem:[%s857_s5 + $0x10] sm:$0xff]  }
   0x7   :  { %v72_v21 = vmul.f32 %v522_v7, %v57_v11  ;;  %583 = vmatpush3.bf16.msra.mxu0 %v641_v1  ;;  %v74_v27 = vmul.f32 %v522_v7, %v59_v18  ;;  %593 = vmatpush3.bf16.msra.mxu1 %v642_v24  ;;  %v75_v31 = vmul.f32 %v522_v7, %v60_v22  ;;  %v648_v38 = vld [vmem:[%s857_s5 + $0x8] sm:$0xff]   ;;  %v649_v39 = vld [vmem:[%s857_s5] sm:$0xff]   ;;  %v650_v40 = vld [vmem:[%s858_s7 + $0x38] sm:$0xff]  }
   0x8   :  { %v77_v25 = vpack.c.bf16 %v70_v16, %v69_v15  ;;  %v73_v26 = vmul.f32 %v522_v7, %v58_v17  ;;  %v76_v32 = vmul.f32 %v522_v7, %v61_v23  ;;  %594 = vmatprep.subr.bf16.mxu1 %v643_v28  ;;  %v651_v41 = vld [vmem:[%s858_s7 + $0x30] sm:$0xff]   ;;  %616 = vmatprep.subr.bf16.mxu0 %v650_v40  ;;  %v652_v42 = vld [vmem:[%s858_s7 + $0x28] sm:$0xff]   ;;  %v653_v43 = vld [vmem:[%s858_s7 + $0x20] sm:$0xff]  }
   0x9   :  { %v78_v29 = vpack.c.bf16 %v72_v21, %v71_v20  ;;  %v654_v44 = vld [vmem:[%s858_s7 + $0x18] sm:$0xff]   ;;  %v523_v47 = vld [vmem:[%s859_s4] ss:$0 sm:$0xff]  ;;  %v655_v10 = vld [vmem:[%s858_s7 + $0x10] sm:$0xff]  }
   0xa   :  { %584 = vmatprep.mubr.msk.bf16.mxu0 %vm104_vm0, %v77_v25  ;;  %v79_v30 = vpack.c.bf16 %v74_v27, %v73_v26  ;;  %v80_v34 = vpack.c.bf16 %v76_v32, %v75_v31  ;;  %v656_v11 = vld [vmem:[%s858_s7 + $0x8] sm:$0xff]   ;;  %v657_v12 = vld [vmem:[%s858_s7] sm:$0xff]  }
   0xb   :  { %585 = vmatmul.mubr.msk.bf16.vlgmr.msra.gmra.mxu0 %vm104_vm0, %v78_v29  ;;  %595 = vmatpush3.bf16.msra.mxu1 %v643_v28  ;;  %v530_v15 = vld [vmem:[%s860_s6] ss:$0 sm:$0xff] }
   0xc   :  { %588 = vmatprep.mubr.msk.bf16.mxu0 %vm104_vm0, %v79_v30  ;;  %596 = vmatprep.subr.bf16.mxu1 %v644_v33 }
   0xd   :  { %617 = vmatpush3.bf16.msra.mxu0 %v650_v40 }
   0xe   :  { %618 = vmatprep.subr.bf16.mxu0 %v651_v41 }
   0xf   :  { %597 = vmatpush3.bf16.msra.mxu1 %v644_v33 }
  0x10   :  { %598 = vmatprep.subr.bf16.mxu1 %v645_v35 }
  0x11   :  { %619 = vmatpush3.bf16.msra.mxu0 %v651_v41 }
  0x12   :  { %620 = vmatprep.subr.bf16.mxu0 %v652_v42 }
  0x13   :  { %589 = vmatmul.mubr.msk.bf16.gmra.mxu0 %vm104_vm0, %v80_v34  ;;  %599 = vmatpush3.bf16.msra.mxu1 %v645_v35 }
  0x14   :  { %600 = vmatprep.subr.bf16.mxu1 %v646_v36 }
  0x15   :  { %621 = vmatpush3.bf16.msra.mxu0 %v652_v42  ;;  %v539_v42 = vld [vmem:[%s861_s8] ss:$0 sm:$0xff] }
  0x16   :  { %622 = vmatprep.subr.bf16.mxu0 %v653_v43 }
  0x17   :  { %601 = vmatpush3.bf16.msra.mxu1 %v646_v36 }
  0x18   :  { %602 = vmatprep.subr.bf16.mxu1 %v647_v37 }
  0x19   :  { %623 = vmatpush3.bf16.msra.mxu0 %v653_v43 }
  0x1a   :  { %624 = vmatprep.subr.bf16.mxu0 %v654_v44 }
  0x1b   :  { %603 = vmatpush3.bf16.msra.mxu1 %v647_v37 }
  0x1c   :  { %604 = vmatprep.subr.bf16.mxu1 %v648_v38 }
  0x1d   :  { %625 = vmatpush3.bf16.msra.mxu0 %v654_v44  ;;  %v548_v44 = vld [vmem:[%s862_s10] ss:$0 sm:$0xff] }
  0x1e   :  { %626 = vmatprep.subr.bf16.mxu0 %v655_v10 }
  0x1f   :  { %605 = vmatpush3.bf16.msra.mxu1 %v648_v38 }
  0x20   :  { %606 = vmatprep.subr.bf16.mxu1 %v649_v39 }
  0x21   :  { %627 = vmatpush3.bf16.msra.mxu0 %v655_v10 }
  0x22   :  { %628 = vmatprep.subr.bf16.mxu0 %v656_v11 }
  0x23   :  { %607 = vmatpush3.bf16.msra.mxu1 %v649_v39 }
  0x25   :  { %629 = vmatpush3.bf16.msra.mxu0 %v656_v11 }
  0x26   :  { %630 = vmatprep.subr.bf16.mxu0 %v657_v12 }
  0x29   :  { %631 = vmatpush3.bf16.msra.mxu0 %v657_v12 }
  0xcb   :  { %v586_v45 = vpop.f32.mrf.mxu0 }
  0xcc   :  { %v160_v51 = vadd.f32 %v586_v45, %v523_v47 }
  0xcd   :  { %v151_v46 = vpop.f32.mrf.mxu0 }
  0xce   :  { %v152_v49 = vadd.f32 %v523_v47, %v151_v46  ;;  %v184_v58 = vmax.f32 %v160_v51, 0.0  ;;  %v549_v46 = vld [vmem:[%s863_s9] ss:$0 sm:$0xff] }
  0xcf   :  { %v587_v48 = vpop.f32.mrf.mxu0 }
  0xd0   :  { %v163_v50 = vadd.f32 %v587_v48, %v523_v47  ;;  %v182_v56 = vmax.f32 %v152_v49, 0.0 }
  0xd1   :  { %v154_v52 = vpop.f32.mrf.mxu0 }
  0xd2   :  { %v155_v53 = vadd.f32 %v523_v47, %v154_v52  ;;  %v185_v54 = vmax.f32 %v163_v50, 0.0 }
  0xd3   :  { %v590_v55 = vpop.f32.mrf.mxu0 }
  0xd4   :  { %v183_v57 = vmax.f32 %v155_v53, 0.0  ;;  %v191_v61 = vpack.c.bf16 %v185_v54, %v184_v58  ;;  %v176_v1 = vadd.f32 %v590_v55, %v523_v47 }
  0xd5   :  { %v167_v59 = vpop.f32.mrf.mxu0 }
  0xd6   :  { %v190_v60 = vpack.c.bf16 %v183_v57, %v182_v56  ;;  %v168_v63 = vadd.f32 %v523_v47, %v167_v59  ;;  %v188_v7 = vmax.f32 %v176_v1, 0.0 }
  0xd7   :  { %v591_v62 = vpop.f32.mrf.mxu0 }
  0xd8   :  { %v179_v0 = vadd.f32 %v591_v62, %v523_v47  ;;  %608 = vmatprep.mubr.bf16.mxu1 %v190_v60  ;;  %v186_v5 = vmax.f32 %v168_v63, 0.0 }
  0xd9   :  { %v170_v2 = vpop.f32.mrf.mxu0  ;;  %609 = vmatmul.mubr.bf16.vlgmr.msra.gmra.mxu1 %v191_v61 }
  0xda   :  { %v171_v3 = vadd.f32 %v523_v47, %v170_v2  ;;  %v189_v4 = vmax.f32 %v179_v0, 0.0 }
  0xdc   :  { %v187_v6 = vmax.f32 %v171_v3, 0.0  ;;  %v193_v9 = vpack.c.bf16 %v189_v4, %v188_v7 }
  0xde   :  { %v192_v8 = vpack.c.bf16 %v187_v6, %v186_v5 }
  0xe0   :  { %612 = vmatprep.mubr.bf16.mxu1 %v192_v8 }
  0xe1   :  { %613 = vmatmul.mubr.bf16.gmra.mxu1 %v193_v9 }
 0x199   :  { %v610_v13 = vpop.f32.mrf.mxu1 }
 0x19a   :  { %v308_v19 = vadd.f32 %v610_v13, %v530_v15 }
 0x19b   :  { %v299_v14 = vpop.f32.mrf.mxu1 }
 0x19c   :  { %v300_v17 = vadd.f32 %v530_v15, %v299_v14  ;;  %v332_v26 = vmax.f32 %v308_v19, 0.0 }
 0x19d   :  { %v611_v16 = vpop.f32.mrf.mxu1 }
 0x19e   :  { %v311_v18 = vadd.f32 %v611_v16, %v530_v15  ;;  %v330_v24 = vmax.f32 %v300_v17, 0.0 }
 0x19f   :  { %v302_v20 = vpop.f32.mrf.mxu1 }
 0x1a0   :  { %v303_v21 = vadd.f32 %v530_v15, %v302_v20  ;;  %v333_v22 = vmax.f32 %v311_v18, 0.0 }
 0x1a1   :  { %v614_v23 = vpop.f32.mrf.mxu1 }
 0x1a2   :  { %v331_v25 = vmax.f32 %v303_v21, 0.0  ;;  %v339_v29 = vpack.c.bf16 %v333_v22, %v332_v26  ;;  %v324_v33 = vadd.f32 %v614_v23, %v530_v15 }
 0x1a3   :  { %v315_v27 = vpop.f32.mrf.mxu1 }
 0x1a4   :  { %v338_v28 = vpack.c.bf16 %v331_v25, %v330_v24  ;;  %v316_v31 = vadd.f32 %v530_v15, %v315_v27  ;;  %v336_v39 = vmax.f32 %v324_v33, 0.0 }
 0x1a5   :  { %v615_v30 = vpop.f32.mrf.mxu1 }
 0x1a6   :  { %v327_v32 = vadd.f32 %v615_v30, %v530_v15  ;;  %632 = vmatprep.mubr.bf16.mxu0 %v338_v28  ;;  %v334_v37 = vmax.f32 %v316_v31, 0.0 }
 0x1a7   :  { %v318_v34 = vpop.f32.mrf.mxu1  ;;  %633 = vmatmul.mubr.bf16.vlgmr.msra.gmra.mxu0 %v339_v29 }
 0x1a8   :  { %v319_v35 = vadd.f32 %v530_v15, %v318_v34  ;;  %v337_v36 = vmax.f32 %v327_v32, 0.0 }
 0x1aa   :  { %v335_v38 = vmax.f32 %v319_v35, 0.0  ;;  %v341_v41 = vpack.c.bf16 %v337_v36, %v336_v39 }
 0x1ac   :  { %v340_v40 = vpack.c.bf16 %v335_v38, %v334_v37 }
 0x1ae   :  { %636 = vmatprep.mubr.bf16.mxu0 %v340_v40 }
 0x1af   :  { %637 = vmatmul.mubr.bf16.gmra.mxu0 %v341_v41 }
 0x267   :  { %v634_v43 = vpop.f32.mrf.mxu0 }
 0x268   :  { %v456_v45 = vadd.f32 %v634_v43, %v539_v42 }
 0x269   :  { %v447_v47 = vpop.f32.mrf.mxu0 }
 0x26a   :  { %v488_v48 = vmul.f32 %v548_v44, %v456_v45  ;;  %v448_v49 = vadd.f32 %v539_v42, %v447_v47 }
 0x26b   :  { %v635_v50 = vpop.f32.mrf.mxu0 }
 0x26c   :  { %v502_v51 = vadd.f32 %v549_v46, %v488_v48  ;;  %v486_v52 = vmul.f32 %v548_v44, %v448_v49  ;;  %v459_v53 = vadd.f32 %v635_v50, %v539_v42 }
 0x26d   :  { %v450_v54 = vpop.f32.mrf.mxu0 }
 0x26e   :  { %511 = vst.msk [vmem:[%s864_s11 + $0x10] sm:$0xff] %vm508_vm1, %v502_v51  ;;  %v500_v55 = vadd.f32 %v549_v46, %v486_v52  ;;  %v489_v56 = vmul.f32 %v548_v44, %v459_v53  ;;  %v451_v57 = vadd.f32 %v539_v42, %v450_v54 }
 0x26f   :  { %v638_v58 = vpop.f32.mrf.mxu0 }
 0x270   :  { %509 = vst.msk [vmem:[%s864_s11] sm:$0xff] %vm508_vm1, %v500_v55  ;;  %v503_v59 = vadd.f32 %v549_v46, %v489_v56  ;;  %v487_v60 = vmul.f32 %v548_v44, %v451_v57  ;;  %v472_v61 = vadd.f32 %v638_v58, %v539_v42 }
 0x271   :  { %v463_v62 = vpop.f32.mrf.mxu0 }
 0x272   :  { %512 = vst.msk [vmem:[%s864_s11 + $0x18] sm:$0xff] %vm508_vm1, %v503_v59  ;;  %v501_v63 = vadd.f32 %v549_v46, %v487_v60  ;;  %v492_v0 = vmul.f32 %v548_v44, %v472_v61  ;;  %v464_v1 = vadd.f32 %v539_v42, %v463_v62 }
 0x273   :  { %v639_v2 = vpop.f32.mrf.mxu0 }
 0x274   :  { %510 = vst.msk [vmem:[%s864_s11 + $0x8] sm:$0xff] %vm508_vm1, %v501_v63  ;;  %v506_v3 = vadd.f32 %v549_v46, %v492_v0  ;;  %v490_v4 = vmul.f32 %v548_v44, %v464_v1  ;;  %v475_v5 = vadd.f32 %v639_v2, %v539_v42 }
 0x275   :  { %v466_v6 = vpop.f32.mrf.mxu0 }
 0x276   :  { %515 = vst.msk [vmem:[%s864_s11 + $0x30] sm:$0xff] %vm508_vm1, %v506_v3  ;;  %v504_v7 = vadd.f32 %v549_v46, %v490_v4  ;;  %v493_v8 = vmul.f32 %v548_v44, %v475_v5  ;;  %v467_v9 = vadd.f32 %v539_v42, %v466_v6 }
 0x278   :  { %513 = vst.msk [vmem:[%s864_s11 + $0x20] sm:$0xff] %vm508_vm1, %v504_v7  ;;  %v507_v10 = vadd.f32 %v549_v46, %v493_v8  ;;  %v491_v11 = vmul.f32 %v548_v44, %v467_v9 }
 0x27a   :  { %516 = vst.msk [vmem:[%s864_s11 + $0x38] sm:$0xff] %vm508_vm1, %v507_v10  ;;  %v505_v12 = vadd.f32 %v549_v46, %v491_v11 }
 0x27c   :  { %514 = vst.msk [vmem:[%s864_s11 + $0x28] sm:$0xff] %vm508_vm1, %v505_v12 }

</bundles_post_ra>
